<compile_context>
chip_gen: v5e
topology: v5e:2x2
jax: 0.10.0
libtpu: 0.0.40
codegen_flags: <defaults>
</compile_context>

<pallas_src>
import jax
import jax.numpy as jnp
from jax.experimental import pallas as pl
from jax.experimental.pallas import tpu as pltpu


# ----------------------------------------------------------------------------
# Pallas kernels
# ----------------------------------------------------------------------------
def _gsf_stats_kernel(x1_ref, x2_ref, g1_ref, g2_ref,
                      sy1_ref, sr1_ref, sy2_ref, sr2_ref):
    """Partial spatial sums of y = gate*x and r = x - y for both groups.

    Blocks: x* (1, C2, T, HWt), g* (1, 1, T, HWt), s* (1, 1, C2, T).
    """
    x1 = x1_ref[...]
    x2 = x2_ref[...]
    y1 = g1_ref[...] * x1
    y2 = g2_ref[...] * x2
    sy1_ref[...] = jnp.sum(y1, axis=-1)[None]
    sr1_ref[...] = jnp.sum(x1 - y1, axis=-1)[None]
    sy2_ref[...] = jnp.sum(y2, axis=-1)[None]
    sr2_ref[...] = jnp.sum(x2 - y2, axis=-1)[None]


def _gsf_combine_kernel(x1_ref, x2_ref, g1_ref, g2_ref, w1_ref, w2_ref,
                        o1_ref, o2_ref):
    """out = shift(gate*x) * w + (x - gate*x) * (1 - w), per group.

    Temporal shift (zero pad) is done with static slice writes directly into
    the output refs -- no full-block concatenate / iota / where temporaries.
    """
    T = x1_ref.shape[2]
    x1 = x1_ref[...]
    x2 = x2_ref[...]
    y1 = g1_ref[...] * x1
    y2 = g2_ref[...] * x2
    r1 = x1 - y1
    r2 = x2 - y2
    w1 = w1_ref[...]            # (1, C2, T, 1), broadcast over lanes
    w2 = w2_ref[...]
    rw1 = 1.0 - w1
    rw2 = 1.0 - w2

    # group 1: left temporal shift of y1 (y1[t] <- y1[t+1], zero at last frame)
    o1_ref[:, :, :T - 1, :] = (y1[:, :, 1:, :] * w1[:, :, :T - 1, :]
                               + r1[:, :, :T - 1, :] * rw1[:, :, :T - 1, :])
    o1_ref[:, :, T - 1:, :] = r1[:, :, T - 1:, :] * rw1[:, :, T - 1:, :]

    # group 2: right temporal shift of y2 (y2[t] <- y2[t-1], zero at first frame)
    o2_ref[:, :, 1:, :] = (y2[:, :, :T - 1, :] * w2[:, :, 1:, :]
                           + r2[:, :, 1:, :] * rw2[:, :, 1:, :])
    o2_ref[:, :, :1, :] = r2[:, :, :1, :] * rw2[:, :, :1, :]


# ----------------------------------------------------------------------------
# Dense conv / BN branches (XLA)
# ----------------------------------------------------------------------------
def _gate_branch(x5, params):
    """BatchNorm3d (inference mode) + ReLU + grouped Conv3d 3x3x3 + tanh."""
    c = x5.shape[1]
    brd = lambda p: p.reshape(1, c, 1, 1, 1)
    x_bn = (x5 - brd(params["bn_mean"])) * jax.lax.rsqrt(brd(params["bn_var"]) + 1e-5)
    x_bn = x_bn * brd(params["bn_gamma"]) + brd(params["bn_beta"])
    x_act = jax.nn.relu(x_bn)
    gate = jax.lax.conv_general_dilated(
        x_act, params["c3d_w"],
        window_strides=(1, 1, 1),
        padding=((1, 1), (1, 1), (1, 1)),
        dimension_numbers=("NCDHW", "OIDHW", "NCDHW"),
        feature_group_count=2)
    gate = gate + params["c3d_b"].reshape(1, 2, 1, 1, 1)
    return jnp.tanh(gate)                                  # (B, 2, T, H, W)


def _channel_gate(m_y, m_r, w, b):
    """torch: cat([y, r], dim=3).permute(0,3,1,2) -> Conv2d(2->1,3,pad1) -> sigmoid."""
    yr = jnp.stack([m_y, m_r], axis=1)                     # (B, 2, C2, T)
    out = jax.lax.conv_general_dilated(
        yr, w, window_strides=(1, 1), padding=((1, 1), (1, 1)),
        dimension_numbers=("NCHW", "OIHW", "NCHW"))
    out = out + b.reshape(1, 1, 1, 1)
    return jax.nn.sigmoid(out[:, 0])                       # (B, C2, T)


def _pick_hw_tile(hw):
    """Largest lane-dense (multiple of 128) tile <= 512 that divides H*W."""
    for t in (512, 384, 256, 128):
        if hw % t == 0:
            return t
    return hw   # full extent is always a legal block dim


# ----------------------------------------------------------------------------
# Forward pass
# ----------------------------------------------------------------------------
def gsf_forward(x_full, params, *, num_segments, fPlane):
    bt, C, H, W = x_full.shape
    assert bt % num_segments == 0, "batch*time must be divisible by num_segments"
    assert fPlane % 4 == 0 and fPlane <= C
    B = bt // num_segments
    T = num_segments
    HW = H * W
    C2 = fPlane // 2
    C4 = fPlane // 4

    # Only the gated fPlane channels are streamed through the Pallas kernels.
    x = x_full[:, :fPlane]
    x5 = x.reshape(B, T, fPlane, H, W).transpose(0, 2, 1, 3, 4)   # (B, fPlane, T, H, W)

    gate = _gate_branch(x5, params)                                # (B, 2, T, H, W)

    xf = x5.reshape(B, fPlane, T, HW)
    gf = gate.reshape(B, 2, T, HW)
    x1 = xf[:, :C2]
    x2 = xf[:, C2:]
    g1 = gf[:, 0:1]
    g2 = gf[:, 1:2]

    hw_tile = _pick_hw_tile(HW)
    n_hw = HW // hw_tile
    # Blocks are (1, C2, T, hw_tile) f32 -- tiny vs. the 32 MiB scoped VMEM
    # default (and v7x's 64 MiB physical), so no vmem_limit override needed.

    x_spec = pl.BlockSpec((1, C2, T, hw_tile), lambda b, h: (b, 0, 0, h))
    g_spec = pl.BlockSpec((1, 1, T, hw_tile), lambda b, h: (b, 0, 0, h))
    s_spec = pl.BlockSpec((1, 1, C2, T), lambda b, h: (b, h, 0, 0))
    w_spec = pl.BlockSpec((1, C2, T, 1), lambda b, h: (b, 0, 0, 0))

    # Kernel 1: per-tile partial spatial sums (both grid axes fully parallel).
    sum_shape = jax.ShapeDtypeStruct((B, n_hw, C2, T), jnp.float32)
    sy1, sr1, sy2, sr2 = pl.pallas_call(
        _gsf_stats_kernel,
        out_shape=(sum_shape, sum_shape, sum_shape, sum_shape),
        grid_spec=pl.GridSpec(
            grid=(B, n_hw),
            in_specs=[x_spec, x_spec, g_spec, g_spec],
            out_specs=(s_spec, s_spec, s_spec, s_spec),
        ),
        compiler_params=pltpu.CompilerParams(
            dimension_semantics=("parallel", "parallel")),
    )(x1, x2, g1, g2)

    inv_hw = jnp.float32(1.0 / HW)
    m_y1 = sy1.sum(axis=1) * inv_hw        # (B, C2, T), spatial means (pre-shift)
    m_r1 = sr1.sum(axis=1) * inv_hw
    m_y2 = sy2.sum(axis=1) * inv_hw
    m_r2 = sr2.sum(axis=1) * inv_hw

    # Temporal shift commutes with the spatial mean (zero-padded frame -> 0 mean).
    zpad = jnp.zeros_like(m_y1[:, :, :1])
    m_y1s = jnp.concatenate([m_y1[:, :, 1:], zpad], axis=2)
    m_y2s = jnp.concatenate([zpad, m_y2[:, :, :-1]], axis=2)

    w1 = _channel_gate(m_y1s, m_r1, params["cc1_w"], params["cc1_b"])   # (B, C2, T)
    w2 = _channel_gate(m_y2s, m_r2, params["cc2_w"], params["cc2_b"])

    # Kernel 2: shifted-gated / residual blend, lane-dense tiled output.
    o_shape = jax.ShapeDtypeStruct((B, C2, T, HW), x_full.dtype)
    o1, o2 = pl.pallas_call(
        _gsf_combine_kernel,
        out_shape=(o_shape, o_shape),
        grid_spec=pl.GridSpec(
            grid=(B, n_hw),
            in_specs=[x_spec, x_spec, g_spec, g_spec, w_spec, w_spec],
            out_specs=(x_spec, x_spec),
        ),
        compiler_params=pltpu.CompilerParams(
            dimension_semantics=("parallel", "parallel")),
    )(x1, x2, g1, g2, w1[..., None], w2[..., None])

    # PyTorch's view(B, 2, fPlane//4, ...).permute(...).view(...) channel interleave.
    def _interleave(o):
        return (o.reshape(B, 2, C4, T, HW)
                 .transpose(0, 2, 1, 3, 4)
                 .reshape(B, C2, T, HW))

    y = jnp.concatenate([_interleave(o1), _interleave(o2)], axis=1)   # (B, fPlane, T, HW)
    y = y.transpose(0, 2, 1, 3).reshape(bt, fPlane, H, W)
    # Identity channels bypass the kernels entirely.
    return jnp.concatenate([y, x_full[:, fPlane:]], axis=1)


# ----------------------------------------------------------------------------
# Pure-JAX reference (mirrors the PyTorch forward op-for-op)
# ----------------------------------------------------------------------------
def gsf_reference(x_full, params, *, num_segments, fPlane):
    bt, C, H, W = x_full.shape
    B = bt // num_segments
    T = num_segments
    C2 = fPlane // 2
    C4 = fPlane // 4
    x = x_full[:, :fPlane]
    x5 = x.reshape(B, T, fPlane, H, W).transpose(0, 2, 1, 3, 4)
    gate = _gate_branch(x5, params)
    g1 = gate[:, 0:1]
    g2 = gate[:, 1:2]
    x1 = x5[:, :C2]
    x2 = x5[:, C2:]
    y1 = g1 * x1
    y2 = g2 * x2
    r1 = x1 - y1
    r2 = x2 - y2
    y1s = jnp.concatenate([y1[:, :, 1:], jnp.zeros_like(y1[:, :, :1])], axis=2)
    y2s = jnp.concatenate([jnp.zeros_like(y2[:, :, :1]), y2[:, :, :-1]], axis=2)
    sp_mean = lambda a: a.mean(axis=(-2, -1))
    w1 = _channel_gate(sp_mean(y1s), sp_mean(r1), params["cc1_w"], params["cc1_b"])
    w2 = _channel_gate(sp_mean(y2s), sp_mean(r2), params["cc2_w"], params["cc2_b"])
    w1 = w1[..., None, None]
    w2 = w2[..., None, None]
    y1o = y1s * w1 + r1 * (1.0 - w1)
    y2o = y2s * w2 + r2 * (1.0 - w2)

    def il(o):
        return (o.reshape(B, 2, C4, T, H, W)
                 .transpose(0, 2, 1, 3, 4, 5)
                 .reshape(B, C2, T, H, W))

    y = jnp.concatenate([il(y1o), il(y2o)], axis=1)
    y = y.transpose(0, 2, 1, 3, 4).reshape(bt, fPlane, H, W)
    return jnp.concatenate([y, x_full[:, fPlane:]], axis=1)


# ----------------------------------------------------------------------------
if __name__ == "__main__":
    # Module defaults: num_segments=8, gsf_ch_ratio=25.
    num_segments = 8
    gsf_ch_ratio = 25
    batch = 2
    C, H, W = 32, 16, 16
    bt = batch * num_segments

    fPlane = int(C * gsf_ch_ratio / 100)
    if fPlane % 2 != 0:
        fPlane += 1                         # matches the PyTorch __init__
    assert fPlane % 4 == 0                  # required by the module's view/permute

    key = jax.random.PRNGKey(0)
    ks = jax.random.split(key, 11)
    params = {
        "bn_gamma": jax.random.uniform(ks[0], (fPlane,), jnp.float32, 0.5, 1.5),
        "bn_beta": 0.1 * jax.random.normal(ks[1], (fPlane,), jnp.float32),
        "bn_mean": 0.1 * jax.random.normal(ks[2], (fPlane,), jnp.float32),
        "bn_var": jax.random.uniform(ks[3], (fPlane,), jnp.float32, 0.5, 1.5),
        "c3d_w": 0.1 * jax.random.normal(ks[4], (2, fPlane // 2, 3, 3, 3), jnp.float32),
        "c3d_b": 0.1 * jax.random.normal(ks[5], (2,), jnp.float32),
        "cc1_w": 0.1 * jax.random.normal(ks[6], (1, 2, 3, 3), jnp.float32),
        "cc1_b": 0.1 * jax.random.normal(ks[7], (1,), jnp.float32),
        "cc2_w": 0.1 * jax.random.normal(ks[8], (1, 2, 3, 3), jnp.float32),
        "cc2_b": 0.1 * jax.random.normal(ks[9], (1,), jnp.float32),
    }
    x_full = jax.random.normal(ks[10], (bt, C, H, W), jnp.float32)

    out = gsf_forward(x_full, params, num_segments=num_segments, fPlane=fPlane)
    out = jax.block_until_ready(out)

    ref = gsf_reference(x_full, params, num_segments=num_segments, fPlane=fPlane)
    assert out.shape == ref.shape == x_full.shape
    assert jnp.allclose(out, ref, atol=1e-5, rtol=1e-5), \
        f"max abs diff {float(jnp.max(jnp.abs(out - ref)))}"

    print("KERNEL_OK")
</pallas_src>

<mosaic_0001>
module attributes {stable_mosaic.version = 11 : i64} {
  func.func @_gsf_stats_kernel(%arg0: i32, %arg1: i32, %arg2: memref<1x4x8x256xf32, #tpu.memory_space<vmem>>, %arg3: memref<1x4x8x256xf32, #tpu.memory_space<vmem>>, %arg4: memref<1x1x8x256xf32, #tpu.memory_space<vmem>>, %arg5: memref<1x1x8x256xf32, #tpu.memory_space<vmem>>, %arg6: memref<1x1x4x8xf32, #tpu.memory_space<vmem>>, %arg7: memref<1x1x4x8xf32, #tpu.memory_space<vmem>>, %arg8: memref<1x1x4x8xf32, #tpu.memory_space<vmem>>, %arg9: memref<1x1x4x8xf32, #tpu.memory_space<vmem>>) attributes {dimension_semantics = [#tpu.dimension_semantics<parallel>, #tpu.dimension_semantics<parallel>], iteration_bounds = array<i64: 2, 1>, scalar_prefetch = 0 : i64, scratch_operands = 0 : i64, tpu.core_type = #tpu.core_type<tc>, window_params = [{transform_indices = @transform_0, window_bounds = array<i64: 1, 4, 8, 256>}, {transform_indices = @transform_1, window_bounds = array<i64: 1, 4, 8, 256>}, {transform_indices = @transform_2, window_bounds = array<i64: 1, 1, 8, 256>}, {transform_indices = @transform_3, window_bounds = array<i64: 1, 1, 8, 256>}, {transform_indices = @transform_4, window_bounds = array<i64: 1, 1, 4, 8>}, {transform_indices = @transform_5, window_bounds = array<i64: 1, 1, 4, 8>}, {transform_indices = @transform_6, window_bounds = array<i64: 1, 1, 4, 8>}, {transform_indices = @transform_7, window_bounds = array<i64: 1, 1, 4, 8>}]} {
    %c0 = arith.constant 0 : index
    %c0_0 = arith.constant 0 : index
    %c0_1 = arith.constant 0 : index
    %c0_2 = arith.constant 0 : index
    %0 = vector.load %arg2[%c0, %c0_0, %c0_1, %c0_2] : memref<1x4x8x256xf32, #tpu.memory_space<vmem>>, vector<1x4x8x256xf32>
    %c0_3 = arith.constant 0 : index
    %c0_4 = arith.constant 0 : index
    %c0_5 = arith.constant 0 : index
    %c0_6 = arith.constant 0 : index
    %1 = vector.load %arg3[%c0_3, %c0_4, %c0_5, %c0_6] : memref<1x4x8x256xf32, #tpu.memory_space<vmem>>, vector<1x4x8x256xf32>
    %c0_7 = arith.constant 0 : index
    %c0_8 = arith.constant 0 : index
    %c0_9 = arith.constant 0 : index
    %c0_10 = arith.constant 0 : index
    %2 = vector.load %arg4[%c0_7, %c0_8, %c0_9, %c0_10] : memref<1x1x8x256xf32, #tpu.memory_space<vmem>>, vector<1x1x8x256xf32>
    %3 = vector.broadcast %2 : vector<1x1x8x256xf32> to vector<1x4x8x256xf32>
    %4 = arith.mulf %3, %0 : vector<1x4x8x256xf32>
    %c0_11 = arith.constant 0 : index
    %c0_12 = arith.constant 0 : index
    %c0_13 = arith.constant 0 : index
    %c0_14 = arith.constant 0 : index
    %5 = vector.load %arg5[%c0_11, %c0_12, %c0_13, %c0_14] : memref<1x1x8x256xf32, #tpu.memory_space<vmem>>, vector<1x1x8x256xf32>
    %6 = vector.broadcast %5 : vector<1x1x8x256xf32> to vector<1x4x8x256xf32>
    %7 = arith.mulf %6, %1 : vector<1x4x8x256xf32>
    %cst = arith.constant dense<0.000000e+00> : vector<1x4x8xf32>
    %8 = vector.multi_reduction <add>, %4, %cst [3] : vector<1x4x8x256xf32> to vector<1x4x8xf32>
    %9 = vector.shape_cast %8 : vector<1x4x8xf32> to vector<1x1x4x8xf32>
    %c0_15 = arith.constant 0 : index
    %c0_16 = arith.constant 0 : index
    %c0_17 = arith.constant 0 : index
    %c0_18 = arith.constant 0 : index
    %10 = vector.load %arg6[%c0_15, %c0_16, %c0_17, %c0_18] : memref<1x1x4x8xf32, #tpu.memory_space<vmem>>, vector<1x1x4x8xf32>
    tpu.vector_store %arg6[%c0_15, %c0_16, %c0_17, %c0_18], %9 {strides = array<i32>} : memref<1x1x4x8xf32, #tpu.memory_space<vmem>>, vector<1x1x4x8xf32>,
    %11 = arith.subf %0, %4 : vector<1x4x8x256xf32>
    %cst_19 = arith.constant dense<0.000000e+00> : vector<1x4x8xf32>
    %12 = vector.multi_reduction <add>, %11, %cst_19 [3] : vector<1x4x8x256xf32> to vector<1x4x8xf32>
    %13 = vector.shape_cast %12 : vector<1x4x8xf32> to vector<1x1x4x8xf32>
    %c0_20 = arith.constant 0 : index
    %c0_21 = arith.constant 0 : index
    %c0_22 = arith.constant 0 : index
    %c0_23 = arith.constant 0 : index
    %14 = vector.load %arg7[%c0_20, %c0_21, %c0_22, %c0_23] : memref<1x1x4x8xf32, #tpu.memory_space<vmem>>, vector<1x1x4x8xf32>
    tpu.vector_store %arg7[%c0_20, %c0_21, %c0_22, %c0_23], %13 {strides = array<i32>} : memref<1x1x4x8xf32, #tpu.memory_space<vmem>>, vector<1x1x4x8xf32>,
    %cst_24 = arith.constant dense<0.000000e+00> : vector<1x4x8xf32>
    %15 = vector.multi_reduction <add>, %7, %cst_24 [3] : vector<1x4x8x256xf32> to vector<1x4x8xf32>
    %16 = vector.shape_cast %15 : vector<1x4x8xf32> to vector<1x1x4x8xf32>
    %c0_25 = arith.constant 0 : index
    %c0_26 = arith.constant 0 : index
    %c0_27 = arith.constant 0 : index
    %c0_28 = arith.constant 0 : index
    %17 = vector.load %arg8[%c0_25, %c0_26, %c0_27, %c0_28] : memref<1x1x4x8xf32, #tpu.memory_space<vmem>>, vector<1x1x4x8xf32>
    tpu.vector_store %arg8[%c0_25, %c0_26, %c0_27, %c0_28], %16 {strides = array<i32>} : memref<1x1x4x8xf32, #tpu.memory_space<vmem>>, vector<1x1x4x8xf32>,
    %18 = arith.subf %1, %7 : vector<1x4x8x256xf32>
    %cst_29 = arith.constant dense<0.000000e+00> : vector<1x4x8xf32>
    %19 = vector.multi_reduction <add>, %18, %cst_29 [3] : vector<1x4x8x256xf32> to vector<1x4x8xf32>
    %20 = vector.shape_cast %19 : vector<1x4x8xf32> to vector<1x1x4x8xf32>
    %c0_30 = arith.constant 0 : index
    %c0_31 = arith.constant 0 : index
    %c0_32 = arith.constant 0 : index
    %c0_33 = arith.constant 0 : index
    %21 = vector.load %arg9[%c0_30, %c0_31, %c0_32, %c0_33] : memref<1x1x4x8xf32, #tpu.memory_space<vmem>>, vector<1x1x4x8xf32>
    tpu.vector_store %arg9[%c0_30, %c0_31, %c0_32, %c0_33], %20 {strides = array<i32>} : memref<1x1x4x8xf32, #tpu.memory_space<vmem>>, vector<1x1x4x8xf32>,
    return
  }
  func.func @transform_0(%arg0: i32, %arg1: i32) -> (i32, i32, i32, i32) {
    %c0_i32 = arith.constant 0 : i32
    %c0_i32_0 = arith.constant 0 : i32
    %c0_i32_1 = arith.constant 0 : i32
    return %arg0, %c0_i32, %c0_i32_0, %arg1 : i32, i32, i32, i32
  }
  func.func @transform_1(%arg0: i32, %arg1: i32) -> (i32, i32, i32, i32) {
    %c0_i32 = arith.constant 0 : i32
    %c0_i32_0 = arith.constant 0 : i32
    %c0_i32_1 = arith.constant 0 : i32
    return %arg0, %c0_i32, %c0_i32_0, %arg1 : i32, i32, i32, i32
  }
  func.func @transform_2(%arg0: i32, %arg1: i32) -> (i32, i32, i32, i32) {
    %c0_i32 = arith.constant 0 : i32
    %c0_i32_0 = arith.constant 0 : i32
    %c0_i32_1 = arith.constant 0 : i32
    return %arg0, %c0_i32, %c0_i32_0, %arg1 : i32, i32, i32, i32
  }
  func.func @transform_3(%arg0: i32, %arg1: i32) -> (i32, i32, i32, i32) {
    %c0_i32 = arith.constant 0 : i32
    %c0_i32_0 = arith.constant 0 : i32
    %c0_i32_1 = arith.constant 0 : i32
    return %arg0, %c0_i32, %c0_i32_0, %arg1 : i32, i32, i32, i32
  }
  func.func @transform_4(%arg0: i32, %arg1: i32) -> (i32, i32, i32, i32) {
    %c0_i32 = arith.constant 0 : i32
    %c0_i32_0 = arith.constant 0 : i32
    %c0_i32_1 = arith.constant 0 : i32
    return %arg0, %arg1, %c0_i32, %c0_i32_0 : i32, i32, i32, i32
  }
  func.func @transform_5(%arg0: i32, %arg1: i32) -> (i32, i32, i32, i32) {
    %c0_i32 = arith.constant 0 : i32
    %c0_i32_0 = arith.constant 0 : i32
    %c0_i32_1 = arith.constant 0 : i32
    return %arg0, %arg1, %c0_i32, %c0_i32_0 : i32, i32, i32, i32
  }
  func.func @transform_6(%arg0: i32, %arg1: i32) -> (i32, i32, i32, i32) {
    %c0_i32 = arith.constant 0 : i32
    %c0_i32_0 = arith.constant 0 : i32
    %c0_i32_1 = arith.constant 0 : i32
    return %arg0, %arg1, %c0_i32, %c0_i32_0 : i32, i32, i32, i32
  }
  func.func @transform_7(%arg0: i32, %arg1: i32) -> (i32, i32, i32, i32) {
    %c0_i32 = arith.constant 0 : i32
    %c0_i32_0 = arith.constant 0 : i32
    %c0_i32_1 = arith.constant 0 : i32
    return %arg0, %arg1, %c0_i32, %c0_i32_0 : i32, i32, i32, i32
  }
}

</mosaic_0001>

<bundles_post_ra>
// kernel: tpu_custom_call.1
= control target key start
LH: loop header
LB: loop body
LE: loop exit
PB: predicated region body
PF: predicated region fallthrough
CT: control target
= control target key end

     0   :  { %s1796_s0 = inlined_call_operand.hbm [shape: f32[2,4,8,256], index: 0, kind: input, shape index: {}]   ;;  %s1797_s1 = inlined_call_operand.hbm [shape: f32[2,4,8,256], index: 1, kind: input, shape index: {}]   ;;  %s1798_s2 = inlined_call_operand.hbm [shape: f32[2,1,8,256], index: 2, kind: input, shape index: {}]   ;;  %s1799_s3 = inlined_call_operand.hbm [shape: f32[2,1,8,256], index: 3, kind: input, shape index: {}]   ;;  %s1800_s4 = inlined_call_operand.hbm [shape: f32[2,1,4,8], index: 4, kind: output, shape index: {0}]   ;;  %s1801_s5 = inlined_call_operand.hbm [shape: f32[2,1,4,8], index: 5, kind: output, shape index: {1}]   ;;  %s1802_s6 = inlined_call_operand.hbm [shape: f32[2,1,4,8], index: 6, kind: output, shape index: {2}]   ;;  %s1803_s7 = inlined_call_operand.hbm [shape: f32[2,1,4,8], index: 7, kind: output, shape index: {3}]  }
   0x1   :  { %1814 = sst [smem:[#allocation28_spill]] %s1797_s1 }
   0x2   :  { %1815 = sst [smem:[#allocation29_spill]] %s1800_s4 }
   0x3   :  { %1816 = sst [smem:[#allocation30_spill]] %s1802_s6 }
   0x4   :  { %1817 = sst [smem:[#allocation31_spill]] %s1803_s7 }
   0x5   :  { %13 = vsyncpa [#allocation3], 0 }
   0x6   :  { %15 = vsyncpa [#allocation3 + $0x1], 0 }
   0x7   :  { %16 = vsyncpa [#allocation6], 0 }
   0x8   :  { %18 = vsyncpa [#allocation6 + $0x1], 0 }
   0x9   :  { %19 = vsyncpa [#allocation9], 0 }
   0xa   :  { %21 = vsyncpa [#allocation9 + $0x1], 0 }
   0xb   :  { %22 = vsyncpa [#allocation4], 0 }
   0xc   :  { %24 = vsyncpa [#allocation4 + $0x1], 0 }
   0xd   :  { %25 = vsyncpa [#allocation12], 0 }
   0xe   :  { %27 = vsyncpa [#allocation12 + $0x1], 0 }
   0xf   :  { %28 = vsyncpa [#allocation15], 0 }
  0x10   :  { %30 = vsyncpa [#allocation15 + $0x1], 0  ;;  %s1456_s24 = smov 0   ;;  %s1458_s25 = smov 0  }
  0x11   :  { %s1460_s26 = smov 0   ;;  %s1462_s27 = smov 0  }
  0x12   :  { %s1464_s28 = smov 0   ;;  %s1466_s29 = smov 0  }
  0x13 LB: > { %1818 = sst [smem:[#allocation22_spill]] %s1392_s24  ;;  %s1487_s30 = sadd.s32 4294967295, %s1412_s29   ;;  %s1412_s29 = sphi %s1466_s29, %s36_s29   ;;  %s1408_s28 = sphi %s1464_s28, %s1846_s28   ;;  %s1404_s27 = sphi %s1462_s27, %s1845_s27   ;;  %s1400_s26 = sphi %s1460_s26, %s1841_s26   ;;  %s1396_s25 = sphi %s1458_s25, %s1844_s25   ;;  %s1392_s24 = sphi %s1456_s24, %s1843_s24  }
  0x14   : > { %1819 = sst [smem:[#allocation23_spill]] %s1400_s26  ;;  %s1804_s8 = sadd.s32 4294967294, %s1412_s29  }
  0x15   : > { %1820 = sst [smem:[#allocation24_spill]] %s1412_s29  ;;  %s48_s9 = sadd.s32 1, %s1408_s28 }
  0x16   : > { %s57_s10 = sadd.s32 1, %s1400_s26  ;;  %p50_p0 = scmp.ge.s32.totalorder %s48_s9, 2 }
  0x17   : > { %p64_p1 = scmp.ne.s32.totalorder %s1400_s26, %s1396_s25  ;;  %p65_p2 = scmp.eq.s32.totalorder %s1412_s29, 0 }
  0x18   : > { %p70_p3 = scmp.ne.s32.totalorder %s1396_s25, %s1392_s24  ;;  %s1848_s9 = smov (%p50_p0, %s48_s9), 0 }
  0x19   : > { %1821 = sst [smem:[#allocation25_spill]] %s1848_s9  ;;  %p1499_p4 = por %p65_p2, %p64_p1 }
  0x1a   : > { %p71_p5 = scmp.eq.s32.totalorder %s1487_s30, 0  ;;  %s52_s12 = ssub.s32 %s1408_s28, %s1848_s9 }
  0x1b   : > { %p180_p6 = scmp.eq.s32.totalorder %s1487_s30, 1  ;;  %p55_p7 = scmp.eq.s32.totalorder %s52_s12, 0 }
  0x1c   : > { %p1507_p8 = por %p71_p5, %p70_p3  ;;  %p186_p10 = scmp.eq.s32.totalorder %s1804_s8, 1 }
  0x1d   : > { %p1511_p9 = por %p180_p6, %p64_p1  ;;  %p980_p12 = scmp.ge.s32.totalorder %s1412_s29, 2 }
  0x1e   : > { %s1518_s15 = scalar_select %p55_p7, %s1400_s26, %s57_s10  }
  0x1f   : > { %p1520_p11 = por %p186_p10, %p70_p3  ;;  %p1058_p13 = scmp.lt.s32.totalorder %s1412_s29, 2 }
  0x20   : > { %1825 = sst [smem:[#allocation26_spill]] %s1518_s15  ;;  %s1527_s17 = sand.u32 1, %s1400_s26  }
  0x21   : > { %s1826_s16 = scalar_select %p1520_p11, 1, 0 }
  0x22   : > { %s981_s18 = sshll.u32 %s1527_s17, 6  ;;  %s1012_s19 = sshll.u32 %s1408_s28, 6 }
  0x23   : > { %1827 = sst [smem:[#allocation27_spill]] %s1826_s16  ;;  %p1533_p0 = pnand %p1058_p13, %p1499_p4 }
  0x24   : > { %s314_s21 = sand.u32 1, %s1412_s29   ;;  %s1829_s1 = sld [smem:[#allocation28_spill]] }
  0x25   : > { %s318_s8 = scalar_lea.vmem [#allocation5], %s981_s18  ;;  %s315_s15 = scalar_lea.sflag [#allocation6], %s314_s21 }
  0x26   : > { %s328_s9 = sshll.u32 %s318_s8, 4  ;;  %s1414_s11 = smov 256   ;;  %s329_s9 = int_to_ptr.vmem [resolvable:$true] %s328_s9 }
  0x27   : > { %s1415_s26 = smov 16   ;;  %p993_p1 = scmp.ge.s32.totalorder %s1412_s29, 1 }
  0x28   : > { %p380_p2 = scmp.lt.s32.totalorder %s1412_s29, 3  ;;  %s301_s8 = scalar_lea.hbm %s1796_s0, %s1012_s19 }
  0x29   : > { %s291_s21 = scalar_lea.sflag [#allocation3], %s1527_s17 }
  0x2a   : > { %s325_s10 = scalar_lea.hbm %s1829_s1, %s1012_s19  ;;  %p1545_p3 = pnand %p993_p1, %p380_p2 }
  0x2b   : > { %s326_s12 = sshll.u32 %s325_s10, 4  ;;  %s302_s10 = sshll.u32 %s301_s8, 4  ;;  %s327_s12 = int_to_ptr.hbm [resolvable:$true] %s326_s12  ;;  %s303_s10 = int_to_ptr.hbm [resolvable:$true] %s302_s10 }
  0x2c   : > { %1038 = dma.hbm_to_vmem [thread:$0]  (!%p1533_p0), %s327_s12, 1024, %s329_s9, %s315_s15, %s1414_s11, %s1414_s11, %s1415_s26  }
  0x2d   : > { %s294_s1 = scalar_lea.vmem [#allocation2], %s981_s18  ;;  %s987_s9 = sshll.u32 %s1527_s17, 4 }
  0x2e   : > { %s304_s24 = sshll.u32 %s294_s1, 4  ;;  %s1014_s12 = sshll.u32 %s1408_s28, 4  ;;  %s305_s24 = int_to_ptr.vmem [resolvable:$true] %s304_s24 }
  0x2f   : > { %1035 = dma.hbm_to_vmem [thread:$0]  (!%p1533_p0), %s303_s10, 1024, %s305_s24, %s291_s21, %s1414_s11, %s1414_s11, %s1415_s26  }
  0x30   : > { %s349_s4 = scalar_lea.hbm %s1798_s2, %s1014_s12  ;;  %s342_s22 = scalar_lea.vmem [#allocation7], %s987_s9 }
  0x31   : > { %s351_s6 = sshll.u32 %s349_s4, 4  ;;  %s353_s19 = sshll.u32 %s342_s22, 4  ;;  %s352_s6 = int_to_ptr.hbm [resolvable:$true] %s351_s6  ;;  %s354_s19 = int_to_ptr.vmem [resolvable:$true] %s353_s19 }
  0x32   : > { %1041 = dma.hbm_to_vmem [thread:$0]  (!%p1533_p0), %s352_s6, 256, %s354_s19, %s315_s15  }
  0x33   : > { %s371_s23 = scalar_lea.hbm %s1799_s3, %s1014_s12  ;;  %s364_s24 = scalar_lea.vmem [#allocation8], %s987_s9 }
  0x34   : > { %s375_s26 = sshll.u32 %s364_s24, 4  ;;  %s373_s11 = sshll.u32 %s371_s23, 4  ;;  %s376_s26 = int_to_ptr.vmem [resolvable:$true] %s375_s26  ;;  %s374_s11 = int_to_ptr.hbm [resolvable:$true] %s373_s11 }
  0x35   : > { %s361_s8 = scalar_lea.sflag [#allocation9], %s1527_s17  ;;  %384 = sbr.rel (%p1545_p3) target bundleno = 266 (0x10a), region = 36 }
  0x36   : > { %1044 = dma.hbm_to_vmem [thread:$0]  (!%p1533_p0), %s374_s11, 256, %s376_s26, %s361_s8  }
  0x37   : > { %s1571_s4 = sand.u32 (!%p1545_p3), 1, %s1396_s25  }
  0x38   : > { %s994_s6 = sshll.u32 (!%p1545_p3), %s1571_s4, 6  ;;  %s387_s7 = scalar_lea.sflag (!%p1545_p3), [#allocation3], %s1571_s4 }
  0x39   : > { %s1575_s29 = scalar_lea.vmem (!%p1545_p3), [#allocation2], %s994_s6 }
  0x3a   : > { %1367 = dma.done.wait (%p1507_p8), %s387_s7, 1024  }
  0x3b   : > { %1369 = vsyncadd (%p1507_p8), %s387_s7, 4294966272  ;;  %s396_s15 = sand.u32 1, %s1487_s30   ;;  %s1584_s17 = scalar_lea.vmem [#allocation5], %s994_s6 }
  0x3c   : > { %s397_s16 = scalar_lea.sflag [#allocation6], %s396_s15 }
  0x3d   : > { %1371 = dma.done.wait (%p1507_p8), %s397_s16, 1280  }
  0x3e   : > { %1373 = vsyncadd (%p1507_p8), %s397_s16, 4294966016  ;;  %s996_s20 = sshll.u32 %s1571_s4, 4  ;;  %s417_s21 = scalar_lea.sflag [#allocation9], %s1571_s4 }
  0x3f   : > { %s410_s10 = scalar_lea.vmem [#allocation7], %s996_s20  ;;  %s420_s9 = scalar_lea.vmem [#allocation8], %s996_s20 }
  0x40   : > { %1375 = dma.done.wait (%p1507_p8), %s417_s21, 256  }
  0x41   : > { %1377 = vsyncadd (%p1507_p8), %s417_s21, 4294967040  ;;  %v494_v0 = vld [vmem:[%s1584_s17] sm:$0xff]  ;;  %v495_v1 = vld [vmem:[%s1584_s17 + $0x8] sm:$0xff]  ;;  %s1637_s13 = sshll.u32 %s1404_s27, 2  ;;  %s1641_s12 = sshll.u32 %s1571_s4, 2  ;;  %vm544_vm0 = vcmask 1041409  }
  0x42   : > { %v1598_v2 = vld [vmem:[%s420_s9] sm:$0xff]  ;;  %v1600_v3 = vld [vmem:[%s420_s9 + $0x8] sm:$0xff]  ;;  %s686_s1 = scalar_lea.hbm %s1801_s5, %s1637_s13  ;;  %vm546_vm1 = vcmask 1042434   ;;  %s467_s27 = scalar_lea.vmem [#allocation11], %s1641_s12  ;;  %vm548_vm2 = vcmask 1043459   ;;  %vm551_vm3 = vcmask 60416  }
  0x43   : > { %v514_v4 = vmul.f32 %v1598_v2, %v494_v0  ;;  %v486_v5 = vld [vmem:[%s1575_s29] sm:$0xff]  ;;  %v487_v6 = vld [vmem:[%s1575_s29 + $0x8] sm:$0xff]  ;;  %v515_v7 = vmul.f32 %v1600_v3, %v495_v1  ;;  %v488_v15 = vld [vmem:[%s1575_s29 + $0x10] sm:$0xff]  ;;  %s1651_s18 = sshll.u32 %s467_s27, 4  ;;  %s1653_s23 = sshll.u32 %s686_s1, 4  ;;  %s689_s18 = int_to_ptr.vmem [resolvable:$true] %s1651_s18  ;;  %s691_s23 = int_to_ptr.hbm [resolvable:$true] %s1653_s23 }
  0x44   : > { %v502_v8 = vld [vmem:[%s410_s10] sm:$0xff]  ;;  %v503_v9 = vld [vmem:[%s410_s10 + $0x8] sm:$0xff]  ;;  %s1831_s11 = sld [smem:[#allocation30_spill]]  ;;  %s1677_s20 = scalar_lea.sflag [#allocation12], %s396_s15 }
  0x45   : > { %v490_v10 = vld [vmem:[%s1575_s29 + $0x20] sm:$0xff]  ;;  %v504_v11 = vmul.f32 %v502_v8, %v486_v5  ;;  %v505_v12 = vmul.f32 %v503_v9, %v487_v6  ;;  %v491_v13 = vld [vmem:[%s1575_s29 + $0x28] sm:$0xff]  ;;  %v489_v16 = vld [vmem:[%s1575_s29 + $0x18] sm:$0xff]  ;;  %v586_v17 = vadd.f32 %v515_v7, %v514_v4  ;;  %v506_v19 = vmul.f32 %v502_v8, %v488_v15  ;;  %s1244_s10 = sshra.s32 %s691_s23, 4  ;;  %s1250_s19 = scalar_lea.hbm %s1801_s5, 8  ;;  %s1245_s10 = int_to_ptr.hbm [resolvable:$true] %s1244_s10 }
  0x46   : > { %v508_v14 = vmul.f32 %v502_v8, %v490_v10  ;;  %v509_v18 = vmul.f32 %v503_v9, %v491_v13  ;;  %v507_v23 = vmul.f32 %v503_v9, %v489_v16  ;;  %v496_v27 = vld [vmem:[%s1584_s17 + $0x10] sm:$0xff]  ;;  %v497_v28 = vld [vmem:[%s1584_s17 + $0x18] sm:$0xff]  ;;  %v611_v38 = vsub.f32 %v494_v0, %v514_v4  ;;  %v498_v44 = vld [vmem:[%s1584_s17 + $0x20] sm:$0xff]  ;;  %s1246_s21 = scalar_lea.hbm %s1245_s10, 4  ;;  %p1251_p7 = scmp.lt.s32.totalorder %s1245_s10, %s1801_s5 }
  0x47   : > { %v522_v20 = vadd.f32 %v505_v12, %v504_v11  ;;  %v553_v21 = vsub.f32 %v486_v5, %v504_v11  ;;  %v554_v22 = vsub.f32 %v487_v6, %v505_v12  ;;  %587 = vadd.xlane.f32.xlu2 %v586_v17  ;;  %v555_v29 = vsub.f32 %v488_v15, %v506_v19  ;;  %v492_v40 = vld [vmem:[%s1575_s29 + $0x30] sm:$0xff]  ;;  %v493_v41 = vld [vmem:[%s1575_s29 + $0x38] sm:$0xff]  ;;  %v499_v45 = vld [vmem:[%s1584_s17 + $0x28] sm:$0xff]  ;;  %s1832_s29 = sld [smem:[#allocation29_spill]]  ;;  %p1247_p4 = scmp.ne.s32.totalorder %s1245_s10, %s1246_s21 }
  0x48   : > { %v557_v24 = vsub.f32 %v490_v10, %v508_v14  ;;  %v558_v25 = vsub.f32 %v491_v13, %v509_v18  ;;  %v556_v30 = vsub.f32 %v489_v16, %v507_v23  ;;  %v516_v32 = vmul.f32 %v1598_v2, %v496_v27  ;;  %v500_v55 = vld [vmem:[%s1584_s17 + $0x30] sm:$0xff]  ;;  %v501_v56 = vld [vmem:[%s1584_s17 + $0x38] sm:$0xff]  ;;  %p1252_p8 = scmp.lt.s32.totalorder %s1250_s19, %s1246_s21 }
  0x49   : > { %523 = vadd.xlane.f32.xlu1 %v522_v20  ;;  %v561_v26 = vadd.f32 %v554_v22, %v553_v21  ;;  %v517_v33 = vmul.f32 %v1600_v3, %v497_v28  ;;  %v525_v34 = vadd.f32 %v507_v23, %v506_v19  ;;  %v612_v39 = vsub.f32 %v495_v1, %v515_v7  ;;  %p1248_p5 = pnand %p1247_p4, %p1511_p9 }
  0x4a   : > { %v567_v31 = vadd.f32 %v558_v25, %v557_v24  ;;  %v564_v35 = vadd.f32 %v556_v30, %v555_v29  ;;  %v613_v36 = vsub.f32 %v496_v27, %v516_v32  ;;  %v510_v46 = vmul.f32 %v502_v8, %v492_v40  ;;  %s701_s8 = scalar_lea.hbm %s1831_s11, %s1637_s13  ;;  %p1253_p10 = por %p1252_p8, %p1251_p7 }
  0x4b   : > { %562 = vadd.xlane.f32.xlu0 %v561_v26  ;;  %v614_v37 = vsub.f32 %v497_v28, %v517_v33  ;;  %v619_v43 = vadd.f32 %v612_v39, %v611_v38  ;;  %v511_v47 = vmul.f32 %v503_v9, %v493_v41  ;;  %v589_v48 = vadd.f32 %v517_v33, %v516_v32  ;;  %p1249_p6 = pneg %p1248_p5 }
  0x4c   : > { %v518_v49 = vmul.f32 %v1598_v2, %v498_v44  ;;  %v519_v50 = vmul.f32 %v1600_v3, %v499_v45  ;;  %v559_v51 = vsub.f32 %v492_v40, %v510_v46  ;;  %v528_v57 = vadd.f32 %v509_v18, %v508_v14 }
  0x4d   : > { %v622_v42 = vadd.f32 %v614_v37, %v613_v36  ;;  %v560_v52 = vsub.f32 %v493_v41, %v511_v47  ;;  %v520_v58 = vmul.f32 %v1598_v2, %v500_v55  ;;  %v521_v59 = vmul.f32 %v1600_v3, %v501_v56  ;;  %s1833_s16 = smov %s1832_s29  ;;  %s671_s17 = scalar_lea.hbm %s1832_s29, %s1637_s13 }
  0x4e   : > { %v592_v53 = vadd.f32 %v519_v50, %v518_v49  ;;  %v615_v60 = vsub.f32 %v498_v44, %v518_v49  ;;  %v616_v61 = vsub.f32 %v499_v45, %v519_v50  ;;  %v531_v63 = vadd.f32 %v511_v47, %v510_v46  ;;  %p1254_p13 = pnand %p1253_p10, %p1249_p6 }
  0x4f   : > { %568 = vadd.xlane.f32.xlu2 %v567_v31  ;;  %v570_v54 = vadd.f32 %v560_v52, %v559_v51  ;;  %v595_v62 = vadd.f32 %v521_v59, %v520_v58  ;;  %v617_v1 = vsub.f32 %v500_v55, %v520_v58  ;;  %v618_v4 = vsub.f32 %v501_v56, %v521_v59 }
  0x50   : > { %v625_v0 = vadd.f32 %v616_v61, %v615_v60  ;;  %v538_v10 = vlaneseq }
  0x51   : > { %526 = vadd.xlane.f32.xlu1 %v525_v34  ;;  %v628_v5 = vadd.f32 %v618_v4, %v617_v1 }
  0x52   : > { %v1634_v13 = vand.u32 127, %v538_v10 }
  0x53   : > { %565 = vadd.xlane.f32.xlu0 %v564_v35 }
  0x57   : > { %623 = vadd.xlane.f32.xlu2 %v622_v42 }
  0x59   : > { %620 = vadd.xlane.f32.xlu1 %v619_v43 }
  0x5b   : > { %590 = vadd.xlane.f32.xlu0 %v589_v48 }
  0x5f   : > { %593 = vadd.xlane.f32.xlu2 %v592_v53 }
  0x61   : > { %571 = vadd.xlane.f32.xlu1 %v570_v54 }
  0x63   : > { %529 = vadd.xlane.f32.xlu0 %v528_v57 }
  0x67   : > { %596 = vadd.xlane.f32.xlu2 %v595_v62 }
  0x69   : > { %532 = vadd.xlane.f32.xlu1 %v531_v63 }
  0x6b   : > { %626 = vadd.xlane.f32.xlu0 %v625_v0 }
  0x73   : > { %629 = vadd.xlane.f32.xlu0 %v628_v5 }
  0xba   : > { %v1624_v6 = vpop.xlane.xlu2 %587 }
  0xbc   : > { %v1626_v2 = vpop.xlane.xlu1 %523 }
  0xbd   : > { %v540_v26 = vperm.slane %v1626_v2, %v1634_v13 }
  0xbe   : > { %v563_v3 = vpop.xlane.xlu0 %562 }
  0xbf   : > { %v577_v16 = vperm.slane %v563_v3, %v1634_v13 }
  0xc2   : > { %v569_v7 = vpop.xlane.xlu2 %568 }
  0xc3   : > { %v579_v17 = vperm.slane %v569_v7, %v1634_v13 }
  0xc4   : > { %v1628_v8 = vpop.xlane.xlu1 %526 }
  0xc5   : > { %v541_v27 = vperm.slane %v1628_v8, %v1634_v13 }
  0xc6   : > { %v566_v9 = vpop.xlane.xlu0 %565 }
  0xc7   : > { %v578_v15 = vperm.slane %v566_v9, %v1634_v13 }
  0xc9   : > { %v581_v18 = vsel %vm544_vm0, %v578_v15, %v577_v16 }
  0xca   : > { %v1630_v11 = vpop.xlane.xlu2 %623  ;;  %v582_v22 = vsel %vm546_vm1, %v579_v17, %v581_v18 }
  0xcc   : > { %v1632_v12 = vpop.xlane.xlu1 %620 }
  0xce   : > { %v591_v14 = vpop.xlane.xlu0 %590 }
  0xcf   : > { %v603_v25 = vperm.slane %v591_v14, %v1634_v13 }
  0xd2   : > { %v594_v19 = vpop.xlane.xlu2 %593 }
  0xd3   : > { %v604_v28 = vperm.slane %v594_v19, %v1634_v13 }
  0xd4   : > { %v572_v20 = vpop.xlane.xlu1 %571 }
  0xd5   : > { %v580_v21 = vperm.slane %v572_v20, %v1634_v13 }
  0xd6   : > { %v530_v23 = vpop.xlane.xlu0 %529 }
  0xd7   : > { %v583_v24 = vsel %vm548_vm2, %v580_v21, %v582_v22 }
  0xd8   : > { %585 = vst.msk [vmem:[%s467_s27] sm:$0xf] %vm551_vm3, %v583_v24 }
  0xd9   : > { %1257 = shalt.err (!%p1254_p13)
}
  0xda   : > { %1025 = dma.vmem_to_hbm [thread:$0]  (%p1511_p9), %s689_s18, 64, %s691_s23, %s1677_s20   ;;  %v602_v29 = vperm.slane %v1624_v6, %v1634_v13  ;;  %v542_v30 = vperm.slane %v530_v23, %v1634_v13  ;;  %v597_v31 = vpop.xlane.xlu2 %596  ;;  %v545_v35 = vsel %vm544_vm0, %v541_v27, %v540_v26 }
  0xdb   : > { %s474_s30 = scalar_lea.vmem [#allocation13], %s1641_s12  ;;  %s1696_s24 = sshll.u32 %s701_s8, 4  ;;  %v605_v33 = vperm.slane %v597_v31, %v1634_v13  ;;  %s706_s24 = int_to_ptr.hbm [resolvable:$true] %s1696_s24 }
  0xdc   : > { %s1694_s15 = sshll.u32 %s474_s30, 4  ;;  %s460_s26 = scalar_lea.vmem [#allocation10], %s1641_s12  ;;  %v606_v32 = vsel %vm544_vm0, %v603_v25, %v602_v29  ;;  %v533_v34 = vpop.xlane.xlu1 %532  ;;  %v547_v38 = vsel %vm546_vm1, %v542_v30, %v545_v35  ;;  %s704_s15 = int_to_ptr.vmem [resolvable:$true] %s1694_s15 }
  0xdd   : > { %s1699_s6 = sshll.u32 %s460_s26, 4  ;;  %s1701_s7 = sshll.u32 %s671_s17, 4  ;;  %v607_v36 = vsel %vm546_vm1, %v604_v28, %v606_v32  ;;  %v543_v37 = vperm.slane %v533_v34, %v1634_v13  ;;  %s674_s6 = int_to_ptr.vmem [resolvable:$true] %s1699_s6  ;;  %s676_s7 = int_to_ptr.hbm [resolvable:$true] %s1701_s7 }
  0xde   : > { %v608_v39 = vsel %vm548_vm2, %v605_v33, %v607_v36  ;;  %v627_v40 = vpop.xlane.xlu0 %626  ;;  %s1272_s18 = sshra.s32 %s706_s24, 4  ;;  %s1278_s17 = scalar_lea.hbm %s1831_s11, 8  ;;  %s1273_s18 = int_to_ptr.hbm [resolvable:$true] %s1272_s18 }
  0xdf   : > { %v549_v41 = vsel %vm548_vm2, %v543_v37, %v547_v38  ;;  %610 = vst.msk [vmem:[%s474_s30] sm:$0xf] %vm551_vm3, %v608_v39  ;;  %s1274_s23 = scalar_lea.hbm %s1273_s18, 4  ;;  %p1279_p3 = scmp.lt.s32.totalorder %s1273_s18, %s1831_s11 }
  0xe0   : > { %552 = vst.msk [vmem:[%s460_s26] sm:$0xf] %vm551_vm3, %v549_v41  ;;  %p1275_p0 = scmp.ne.s32.totalorder %s1273_s18, %s1274_s23  ;;  %p1280_p4 = scmp.lt.s32.totalorder %s1278_s17, %s1274_s23 }
  0xe2   : > { %p1276_p1 = pnand %p1275_p0, %p1511_p9  ;;  %p1281_p5 = por %p1280_p4, %p1279_p3 }
  0xe4   : > { %p1277_p2 = pneg %p1276_p1 }
  0xe6   : > { %p1282_p6 = pnand %p1281_p5, %p1277_p2 }
  0xe8   : > { %1285 = shalt.err (!%p1282_p6)
}
  0xe9   : > { %1026 = dma.vmem_to_hbm [thread:$0]  (%p1511_p9), %s704_s15, 64, %s706_s24, %s1677_s20  }
  0xea   : > { %s645_s9 = scalar_lea.sflag [#allocation4], %s1571_s4  ;;  %s1300_s22 = sshra.s32 %s676_s7, 4  ;;  %s1301_s22 = int_to_ptr.hbm [resolvable:$true] %s1300_s22 }
  0xeb   : > { %s1302_s19 = scalar_lea.hbm %s1301_s22, 4  ;;  %s1306_s30 = scalar_lea.hbm %s1833_s16, 8 }
  0xec   : > { %p1303_p7 = scmp.ne.s32.totalorder %s1301_s22, %s1302_s19  ;;  %p1307_p13 = scmp.lt.s32.totalorder %s1301_s22, %s1833_s16 }
  0xed   : > { %p1308_p0 = scmp.lt.s32.totalorder %s1306_s30, %s1302_s19 }
  0xee   : > { %p1304_p8 = pnand %p1303_p7, %p1511_p9 }
  0xef   : > { %p1309_p1 = por %p1308_p0, %p1307_p13 }
  0xf0   : > { %p1305_p10 = pneg %p1304_p8 }
  0xf2   : > { %p1310_p2 = pnand %p1309_p1, %p1305_p10 }
  0xf4   : > { %1313 = shalt.err (!%p1310_p2)
}
  0xf5   : > { %1024 = dma.vmem_to_hbm [thread:$0]  (%p1511_p9), %s674_s6, 64, %s676_s7, %s645_s9   ;;  %v636_v42 = vperm.slane %v1630_v11, %v1634_v13  ;;  %v635_v43 = vperm.slane %v1632_v12, %v1634_v13  ;;  %v637_v44 = vperm.slane %v627_v40, %v1634_v13  ;;  %v630_v45 = vpop.xlane.xlu0 %629 }
  0xf6   : > { %s1834_s24 = sld [smem:[#allocation31_spill]]  ;;  %s481_s29 = scalar_lea.vmem [#allocation14], %s1641_s12  ;;  %v638_v47 = vperm.slane %v630_v45, %v1634_v13 }
  0xf7   : > { %s718_s17 = sshll.u32 %s481_s29, 4  ;;  %v639_v46 = vsel %vm544_vm0, %v636_v42, %v635_v43  ;;  %s719_s17 = int_to_ptr.vmem [resolvable:$true] %s718_s17 }
  0xf8   : > { %v640_v48 = vsel %vm546_vm1, %v637_v44, %v639_v46 }
  0xf9   : > { %v641_v49 = vsel %vm548_vm2, %v638_v47, %v640_v48 }
  0xfa   : > { %643 = vst.msk [vmem:[%s481_s29] sm:$0xf] %vm551_vm3, %v641_v49 }
  0xfc   : > { %s1835_s23 = smov %s1834_s24  ;;  %s716_s8 = scalar_lea.hbm %s1834_s24, %s1637_s13 }
  0xfd   : > { %s720_s10 = sshll.u32 %s716_s8, 4  ;;  %s660_s13 = scalar_lea.sflag [#allocation15], %s1571_s4  ;;  %s721_s10 = int_to_ptr.hbm [resolvable:$true] %s720_s10 }
  0xfe   : > { %s1328_s6 = sshra.s32 %s721_s10, 4  ;;  %s1334_s9 = scalar_lea.hbm %s1835_s23, 8  ;;  %s1329_s6 = int_to_ptr.hbm [resolvable:$true] %s1328_s6 }
  0xff   : > { %s1330_s12 = scalar_lea.hbm %s1329_s6, 4  ;;  %p1335_p6 = scmp.lt.s32.totalorder %s1329_s6, %s1835_s23 }
 0x100   : > { %p1331_p3 = scmp.ne.s32.totalorder %s1329_s6, %s1330_s12  ;;  %p1336_p7 = scmp.lt.s32.totalorder %s1334_s9, %s1330_s12 }
 0x102   : > { %p1332_p4 = pnand %p1331_p3, %p1511_p9  ;;  %p1337_p8 = por %p1336_p7, %p1335_p6 }
 0x104   : > { %p1333_p5 = pneg %p1332_p4 }
 0x106   : > { %p1338_p10 = pnand %p1337_p8, %p1333_p5 }
 0x108   : > { %1341 = shalt.err (!%p1338_p10)
}
 0x109   : > { %1027 = dma.vmem_to_hbm [thread:$0]  (%p1511_p9), %s719_s17, 64, %s721_s10, %s660_s13  }
 0x10a PF: > { %s1836_s4 = sld [smem:[#allocation22_spill]]  ;;  %p1046_p13 = pnand %p980_p12, %p1520_p11 }
 0x10b   : > { %s1838_s27 = sld [smem:[#allocation24_spill]] }
 0x10c   : > { %p1047_p0 = pneg %p1046_p13 }
 0x110   : > { %s732_s30 = sand.u32 1, %s1836_s4  }
 0x111   : > { %s733_s26 = scalar_lea.sflag [#allocation4], %s732_s30 }
 0x112   : > { %1379 = dma.done.wait (%p1047_p0), %s733_s26, 64  }
 0x113   : > { %1381 = vsyncadd (%p1047_p0), %s733_s26, 4294967232  ;;  %s1839_s18 = sadd.s32 4294967294, %s1838_s27  }
 0x114   : > { %s742_s20 = sand.u32 1, %s1839_s18  }
 0x115   : > { %s743_s15 = scalar_lea.sflag [#allocation12], %s742_s20 }
 0x116   : > { %1383 = dma.done.wait (%p1047_p0), %s743_s15, 128  }
 0x117   : > { %1385 = vsyncadd (%p1047_p0), %s743_s15, 4294967168  ;;  %s763_s14 = scalar_lea.sflag [#allocation15], %s732_s30 }
 0x118   : > { %1387 = dma.done.wait (%p1047_p0), %s763_s14, 64  }
 0x119   : > { %1389 = vsyncadd (%p1047_p0), %s763_s14, 4294967232  ;;  %s36_s29 = sadd.s32 1, %s1838_s27   ;;  %s1840_s8 = sld [smem:[#allocation23_spill]] }
 0x11a   : > { %p33_p9 = scmp.ge.s32.totalorder %s36_s29, 4   ;;  %s1841_s26 = sld [smem:[#allocation26_spill]] }
 0x11b   : > { %s1842_s17 = sld [smem:[#allocation25_spill]]  ;;  %s1843_s24 = smov %s1396_s25 }
 0x11c   : > { %s1845_s27 = smov %s1408_s28 }
 0x11d   :  { %35 = sbr.rel (!%p33_p9) target bundleno = 19 (0x13), region = 167 }
 0x11f   : > { %s1844_s25 = smov %s1840_s8 }
 0x121   : > { %s1846_s28 = smov %s1842_s17 }
 0x122   :  { %769 = vsyncpa [#allocation3], 1 }
 0x123   :  { %771 = vsyncpa [#allocation3 + $0x1], 1 }
 0x124   :  { %772 = vsyncpa [#allocation6], 1 }
 0x125   :  { %774 = vsyncpa [#allocation6 + $0x1], 1 }
 0x126   :  { %775 = vsyncpa [#allocation9], 1 }
 0x127   :  { %777 = vsyncpa [#allocation9 + $0x1], 1 }
 0x128   :  { %778 = vsyncpa [#allocation4], 1 }
 0x129   :  { %780 = vsyncpa [#allocation4 + $0x1], 1 }
 0x12a   :  { %781 = vsyncpa [#allocation12], 1 }
 0x12b   :  { %783 = vsyncpa [#allocation12 + $0x1], 1 }
 0x12c   :  { %784 = vsyncpa [#allocation15], 1 }
 0x12d   :  { %786 = vsyncpa [#allocation15 + $0x1], 1 }

</bundles_post_ra>
